<compile_context>
chip_gen: v6e
topology: v6e:2x2x1
jax: 0.10.0
libtpu: 0.0.40
codegen_flags: <defaults>
</compile_context>

<pallas_src>
import functools

import jax
import jax.numpy as jnp
from jax import lax
from jax.experimental import pallas as pl
from jax.experimental.pallas import tpu as pltpu


def _round_up(x, m):
    return (x + m - 1) // m * m


def _largest_divisor_leq(n, cap):
    cap = max(1, min(n, cap))
    for d in range(cap, 0, -1):
        if n % d == 0:
            return d
    return 1


def _vmem_capacity_bytes():
    try:
        return int(pltpu.get_tpu_info().vmem_capacity_bytes)
    except Exception:
        return 64 << 20  # conservative default (v7x per-TC VMEM)


# ---------------------------------------------------------------------------
# Path A: small activations -> single fused, grid-less kernel (1 read+1 write)
# ---------------------------------------------------------------------------
def _fused_bn_relu_kernel(x_ref, gamma_ref, beta_ref, o_ref, *, n_valid, eps):
    # x_ref: (N, C, HW) full block; gamma_ref / beta_ref: (C, 1).
    x = x_ref[...].astype(jnp.float32)
    # Single traversal: per-channel sum and sum-of-squares (Mosaic masks the
    # non-128-aligned lane edge in the reduction, no explicit padding needed).
    s = jnp.sum(x, axis=2, keepdims=True)            # (N, C, 1)
    ss = jnp.sum(x * x, axis=2, keepdims=True)       # (N, C, 1)
    s = jnp.sum(s, axis=0, keepdims=True)            # (1, C, 1)
    ss = jnp.sum(ss, axis=0, keepdims=True)          # (1, C, 1)
    inv_n = jnp.float32(1.0 / n_valid)
    mean = s * inv_n
    var = ss * inv_n - mean * mean                   # biased var (training fwd)
    inv_std = lax.rsqrt(var + jnp.float32(eps))
    scale = inv_std * gamma_ref[...].astype(jnp.float32)   # (1, C, 1)
    shift = beta_ref[...].astype(jnp.float32) - mean * scale
    # 2 VPU ops / element + ReLU, no materialized `centered` temp.
    o_ref[...] = jnp.maximum(x * scale + shift, 0.0).astype(o_ref.dtype)


# ---------------------------------------------------------------------------
# Path B: large activations -> two tiled, auto-pipelined passes.
# ---------------------------------------------------------------------------
def _stats_kernel(x_ref, psum_ref, psumsq_ref, *, hw, tw, ragged):
    # x_ref: (Nb, C, tw); psum_ref / psumsq_ref: (C, 1) (per N-chunk partials).
    t = pl.program_id(1)

    @pl.when(t == 0)
    def _init():
        psum_ref[...] = jnp.zeros_like(psum_ref)
        psumsq_ref[...] = jnp.zeros_like(psumsq_ref)

    x = x_ref[...].astype(jnp.float32)
    if ragged:
        # Only the last tile along T is ragged; the compare is all-true for
        # full tiles so a single unconditional where is the cheapest form.
        lane = lax.broadcasted_iota(jnp.int32, x.shape, dimension=2)
        valid = hw - t * tw
        x = jnp.where(lane < valid, x, 0.0)
    psum_ref[...] += jnp.sum(jnp.sum(x, axis=2, keepdims=True), axis=0)
    psumsq_ref[...] += jnp.sum(jnp.sum(x * x, axis=2, keepdims=True), axis=0)


def _apply_kernel(x_ref, scale_ref, shift_ref, o_ref):
    # x_ref: (Nb, C, tw); scale/shift: (C, 1). OOB lanes of the ragged edge
    # block are never written back (Pallas masks partial-block stores).
    x = x_ref[...].astype(jnp.float32)
    y = x * scale_ref[...] + shift_ref[...]
    o_ref[...] = jnp.maximum(y, 0.0).astype(o_ref.dtype)


# ---------------------------------------------------------------------------
# Wrapper
# ---------------------------------------------------------------------------
def batchnorm_relu(x_nchw, gamma, beta, eps=1e-5, *, tile_w=16384,
                   force_tiled=False):
    N, C, H, W = x_nchw.shape
    HW = H * W
    n_valid = N * HW
    itemsize = x_nchw.dtype.itemsize

    # (N, C, H, W) -> (N, C, H*W): pure reshape, no transpose / extra HBM pass.
    x3 = x_nchw.reshape(N, C, HW)
    gamma2d = gamma.reshape(C, 1).astype(jnp.float32)
    beta2d = beta.reshape(C, 1).astype(jnp.float32)

    vmem_cap = _vmem_capacity_bytes()
    fused_threshold = vmem_cap // 4          # ~32 MiB v5e/v6e, ~16 MiB on v7x
    fused_bytes = N * C * HW * itemsize
    use_fused = (not force_tiled) and fused_bytes <= fused_threshold

    if use_fused:
        out3 = pl.pallas_call(
            functools.partial(_fused_bn_relu_kernel, n_valid=n_valid, eps=eps),
            out_shape=jax.ShapeDtypeStruct((N, C, HW), x_nchw.dtype),
            in_specs=[
                # Full-dim blocks: no (8,128) padding, masked edge stores only.
                pl.BlockSpec((N, C, HW), lambda: (0, 0, 0)),
                pl.BlockSpec((C, 1), lambda: (0, 0)),
                pl.BlockSpec((C, 1), lambda: (0, 0)),
            ],
            out_specs=pl.BlockSpec((N, C, HW), lambda: (0, 0, 0)),
            compiler_params=pltpu.CompilerParams(
                vmem_limit_bytes=min(vmem_cap * 3 // 4, 100 << 20)),
            cost_estimate=pl.CostEstimate(
                flops=6 * N * C * HW, transcendentals=C,
                bytes_accessed=2 * N * C * HW * itemsize),
        )(x3, gamma2d, beta2d)
        return out3.reshape(N, C, H, W)

    # ---------------- tiled path ----------------
    tw = _round_up(min(tile_w, HW), 128)      # lane-tile, 128-aligned
    T = pl.cdiv(HW, tw)                       # no over-padding of the width
    ragged = (HW % tw) != 0
    # Fat blocks: pack several N slices per step when HW is small.
    Nb = _largest_divisor_leq(N, max(1, tile_w // tw))
    GN = N // Nb
    tiled_vmem_limit = min(vmem_cap // 2, 32 << 20)

    # Pass 1 (read-only): per-N-chunk partial sum / sumsq.  The N-chunk axis
    # is "parallel" (megacore-shardable on v7x); the width axis is the
    # reduction ("arbitrary") with the (C,1) partials resident across it.
    psum, psumsq = pl.pallas_call(
        functools.partial(_stats_kernel, hw=HW, tw=tw, ragged=ragged),
        out_shape=(jax.ShapeDtypeStruct((GN, C, 1), jnp.float32),
                   jax.ShapeDtypeStruct((GN, C, 1), jnp.float32)),
        grid=(GN, T),
        in_specs=[pl.BlockSpec((Nb, C, tw), lambda g, t: (g, 0, t))],
        out_specs=(pl.BlockSpec((None, C, 1), lambda g, t: (g, 0, 0)),
                   pl.BlockSpec((None, C, 1), lambda g, t: (g, 0, 0))),
        compiler_params=pltpu.CompilerParams(
            dimension_semantics=("parallel", "arbitrary"),
            vmem_limit_bytes=tiled_vmem_limit),
        cost_estimate=pl.CostEstimate(
            flops=3 * N * C * HW, transcendentals=0,
            bytes_accessed=N * C * HW * itemsize),
    )(x3)

    # Tiny (GN, C, 1) combine + fold into scale/shift in plain JAX.
    s = jnp.sum(psum, axis=0)                 # (C, 1)
    ss = jnp.sum(psumsq, axis=0)              # (C, 1)
    inv_n = jnp.float32(1.0 / n_valid)
    mean = s * inv_n
    var = ss * inv_n - mean * mean
    inv_std = lax.rsqrt(var + jnp.float32(eps))
    scale = inv_std * gamma2d                 # (C, 1)
    shift = beta2d - mean * scale             # (C, 1)

    # Pass 2: elementwise x*scale + shift, ReLU.  Fully parallel grid.
    out3 = pl.pallas_call(
        _apply_kernel,
        out_shape=jax.ShapeDtypeStruct((N, C, HW), x_nchw.dtype),
        grid=(GN, T),
        in_specs=[
            pl.BlockSpec((Nb, C, tw), lambda g, t: (g, 0, t)),
            pl.BlockSpec((C, 1), lambda g, t: (0, 0)),
            pl.BlockSpec((C, 1), lambda g, t: (0, 0)),
        ],
        out_specs=pl.BlockSpec((Nb, C, tw), lambda g, t: (g, 0, t)),
        compiler_params=pltpu.CompilerParams(
            dimension_semantics=("parallel", "parallel"),
            vmem_limit_bytes=tiled_vmem_limit),
        cost_estimate=pl.CostEstimate(
            flops=3 * N * C * HW, transcendentals=0,
            bytes_accessed=2 * N * C * HW * itemsize),
    )(x3, scale, shift)

    return out3.reshape(N, C, H, W)


if __name__ == "__main__":
    def reference(x, gamma, beta, eps=1e-5):
        Cc = x.shape[1]
        mean = jnp.mean(x, axis=(0, 2, 3), keepdims=True)
        var = jnp.mean((x - mean) ** 2, axis=(0, 2, 3), keepdims=True)
        return jnp.maximum(
            (x - mean) * lax.rsqrt(var + eps) * gamma.reshape(1, Cc, 1, 1)
            + beta.reshape(1, Cc, 1, 1), 0.0)

    # --- module's shape: BatchNorm2d(48) + ReLU on (1, 48, 14, 14) ----------
    key = jax.random.PRNGKey(0)
    N, C, H, W = 1, 48, 14, 14
    x = jax.random.normal(key, (N, C, H, W), dtype=jnp.float32)
    gamma = jnp.ones((C,), dtype=jnp.float32)     # PyTorch default affine init
    beta = jnp.zeros((C,), dtype=jnp.float32)
    # TODO(synk): running_mean/running_var momentum update is a training-state
    # side effect that does not affect the forward output; not reproduced.

    out = batchnorm_relu(x, gamma, beta, eps=1e-5)
    jax.block_until_ready(out)
    ref = reference(x, gamma, beta)
    assert out.shape == (N, C, H, W)
    assert jnp.allclose(out, ref, atol=1e-4, rtol=1e-4)

    # --- tiled path: multi-tile reduction (T>1) + parallel N chunks (GN>1) ---
    N2, C2, H2, W2 = 2, 48, 32, 32
    x2 = jax.random.normal(jax.random.PRNGKey(1), (N2, C2, H2, W2), jnp.float32)
    g2 = 1.0 + 0.1 * jax.random.normal(jax.random.PRNGKey(2), (C2,), jnp.float32)
    b2 = 0.1 * jax.random.normal(jax.random.PRNGKey(3), (C2,), jnp.float32)
    out2 = batchnorm_relu(x2, g2, b2, eps=1e-5, tile_w=512, force_tiled=True)
    jax.block_until_ready(out2)
    assert jnp.allclose(out2, reference(x2, g2, b2), atol=1e-4, rtol=1e-4)

    # --- tiled path: ragged (non-128) width with masked edge tile + Nb>1 -----
    N3, C3, H3, W3 = 4, 48, 14, 14
    x3_ = jax.random.normal(jax.random.PRNGKey(4), (N3, C3, H3, W3), jnp.float32)
    g3 = 1.0 + 0.1 * jax.random.normal(jax.random.PRNGKey(5), (C3,), jnp.float32)
    b3 = 0.1 * jax.random.normal(jax.random.PRNGKey(6), (C3,), jnp.float32)
    out3_ = batchnorm_relu(x3_, g3, b3, eps=1e-5, tile_w=1024, force_tiled=True)
    jax.block_until_ready(out3_)
    assert jnp.allclose(out3_, reference(x3_, g3, b3), atol=1e-4, rtol=1e-4)

    print("KERNEL_OK")
</pallas_src>

<mosaic_0001>
module attributes {stable_mosaic.version = 11 : i64} {
  func.func @_fused_bn_relu_kernel(%arg0: memref<1x48x196xf32, #tpu.memory_space<vmem>>, %arg1: memref<48x1xf32, #tpu.memory_space<vmem>>, %arg2: memref<48x1xf32, #tpu.memory_space<vmem>>, %arg3: memref<1x48x196xf32, #tpu.memory_space<vmem>>) attributes {dimension_semantics = [], scalar_prefetch = 0 : i64, scratch_operands = 0 : i64, tpu.core_type = #tpu.core_type<tc>} {
    %c0 = arith.constant 0 : index
    %c0_0 = arith.constant 0 : index
    %c0_1 = arith.constant 0 : index
    %0 = vector.load %arg0[%c0, %c0_0, %c0_1] : memref<1x48x196xf32, #tpu.memory_space<vmem>>, vector<1x48x196xf32>
    %cst = arith.constant dense<0.000000e+00> : vector<1x48xf32>
    %1 = vector.multi_reduction <add>, %0, %cst [2] : vector<1x48x196xf32> to vector<1x48xf32>
    %2 = vector.shape_cast %1 : vector<1x48xf32> to vector<1x48x1xf32>
    %3 = arith.mulf %0, %0 : vector<1x48x196xf32>
    %cst_2 = arith.constant dense<0.000000e+00> : vector<1x48xf32>
    %4 = vector.multi_reduction <add>, %3, %cst_2 [2] : vector<1x48x196xf32> to vector<1x48xf32>
    %5 = vector.shape_cast %4 : vector<1x48xf32> to vector<1x48x1xf32>
    %cst_3 = arith.constant dense<0.000000e+00> : vector<48x1xf32>
    %6 = vector.multi_reduction <add>, %2, %cst_3 [0] : vector<1x48x1xf32> to vector<48x1xf32>
    %7 = vector.shape_cast %6 : vector<48x1xf32> to vector<1x48x1xf32>
    %cst_4 = arith.constant dense<0.000000e+00> : vector<48x1xf32>
    %8 = vector.multi_reduction <add>, %5, %cst_4 [0] : vector<1x48x1xf32> to vector<48x1xf32>
    %9 = vector.shape_cast %8 : vector<48x1xf32> to vector<1x48x1xf32>
    %cst_5 = arith.constant 0.00510204071 : f32
    %10 = vector.broadcast %cst_5 : f32 to vector<1x48x1xf32>
    %11 = arith.mulf %7, %10 : vector<1x48x1xf32>
    %cst_6 = arith.constant 0.00510204071 : f32
    %12 = vector.broadcast %cst_6 : f32 to vector<1x48x1xf32>
    %13 = arith.mulf %9, %12 : vector<1x48x1xf32>
    %14 = arith.mulf %11, %11 : vector<1x48x1xf32>
    %15 = arith.subf %13, %14 : vector<1x48x1xf32>
    %cst_7 = arith.constant 9.99999974E-6 : f32
    %16 = vector.broadcast %cst_7 : f32 to vector<1x48x1xf32>
    %17 = arith.addf %15, %16 : vector<1x48x1xf32>
    %18 = math.rsqrt %17 : vector<1x48x1xf32>
    %c0_8 = arith.constant 0 : index
    %c0_9 = arith.constant 0 : index
    %19 = vector.load %arg1[%c0_8, %c0_9] : memref<48x1xf32, #tpu.memory_space<vmem>>, vector<48x1xf32>
    %20 = vector.shape_cast %19 : vector<48x1xf32> to vector<1x48x1xf32>
    %21 = arith.mulf %18, %20 : vector<1x48x1xf32>
    %c0_10 = arith.constant 0 : index
    %c0_11 = arith.constant 0 : index
    %22 = vector.load %arg2[%c0_10, %c0_11] : memref<48x1xf32, #tpu.memory_space<vmem>>, vector<48x1xf32>
    %23 = arith.mulf %11, %21 : vector<1x48x1xf32>
    %24 = vector.shape_cast %22 : vector<48x1xf32> to vector<1x48x1xf32>
    %25 = arith.subf %24, %23 : vector<1x48x1xf32>
    %26 = vector.broadcast %21 : vector<1x48x1xf32> to vector<1x48x196xf32>
    %27 = arith.mulf %0, %26 : vector<1x48x196xf32>
    %28 = vector.broadcast %25 : vector<1x48x1xf32> to vector<1x48x196xf32>
    %29 = arith.addf %27, %28 : vector<1x48x196xf32>
    %cst_12 = arith.constant 0.000000e+00 : f32
    %30 = vector.broadcast %cst_12 : f32 to vector<1x48x196xf32>
    %31 = arith.maximumf %29, %30 : vector<1x48x196xf32>
    %c0_13 = arith.constant 0 : index
    %c0_14 = arith.constant 0 : index
    %c0_15 = arith.constant 0 : index
    %32 = vector.load %arg3[%c0_13, %c0_14, %c0_15] : memref<1x48x196xf32, #tpu.memory_space<vmem>>, vector<1x48x196xf32>
    tpu.vector_store %arg3[%c0_13, %c0_14, %c0_15], %31 {strides = array<i32>} : memref<1x48x196xf32, #tpu.memory_space<vmem>>, vector<1x48x196xf32>,
    return
  }
}

</mosaic_0001>

<bundles_post_ra>
// kernel: tpu_custom_call.1
= control target key start
LH: loop header
LB: loop body
LE: loop exit
PB: predicated region body
PF: predicated region fallthrough
CT: control target
= control target key end

     0   :  { %vm27_vm0 = vcmask 556032   ;;  %s539_s0 = inlined_call_operand.vmem [shape: f32[1,48,196], index: 0, kind: input, shape index: {}]   ;;  %s540_s1 = inlined_call_operand.vmem [shape: f32[48,1], index: 1, kind: input, shape index: {}]   ;;  %s541_s2 = inlined_call_operand.vmem [shape: f32[48,1], index: 2, kind: input, shape index: {}]   ;;  %s542_s3 = inlined_call_operand.hbm [shape: f32[1,48,196], index: 3, kind: output, shape index: {}]  }
   0x1   :  { %v357_v0 = vld [vmem:[%s539_s0 + $0x20] sm:$0xff]  ;;  %v362_v1 = vld [vmem:[%s539_s0 + $0x28] sm:$0xff]  ;;  %v379_v5 = vld [vmem:[%s539_s0 + $0x30] sm:$0xff] }
   0x2   :  { %v367_v2 = vld [vmem:[%s539_s0] sm:$0xff]  ;;  %v36_v3 = vsel %vm27_vm0, %v362_v1, 0.0  ;;  %v374_v4 = vld [vmem:[%s539_s0 + $0x8] sm:$0xff]  ;;  %v384_v6 = vld [vmem:[%s539_s0 + $0x38] sm:$0xff] }
   0x3   :  { %v37_v7 = vadd.f32 %v36_v3, %v357_v0  ;;  %v28_v8 = vsel %vm27_vm0, %v374_v4, 0.0  ;;  %v40_v9 = vsel %vm27_vm0, %v384_v6, 0.0  ;;  %v394_v10 = vld [vmem:[%s539_s0 + $0x10] sm:$0xff]  ;;  %v399_v11 = vld [vmem:[%s539_s0 + $0x18] sm:$0xff]  ;;  %v412_v15 = vld [vmem:[%s539_s0 + $0x48] sm:$0xff] }
   0x4   :  { %v29_v12 = vadd.f32 %v28_v8, %v367_v2  ;;  %v32_v13 = vsel %vm27_vm0, %v399_v11, 0.0  ;;  %v407_v14 = vld [vmem:[%s539_s0 + $0x58] sm:$0xff]  ;;  %v41_v16 = vadd.f32 %v40_v9, %v379_v5 }
   0x5   :  { %38 = vadd.xlane.f32.xlu1 %v37_v7 }
   0x6   :  { %8 = vsyncpa [#allocation3], 0  ;;  %30 = vadd.xlane.f32.xlu0 %v29_v12  ;;  %v33_v17 = vadd.f32 %v32_v13, %v394_v10  ;;  %v419_v18 = vld [vmem:[%s539_s0 + $0x50] sm:$0xff]  ;;  %v48_v19 = vsel %vm27_vm0, %v407_v14, 0.0  ;;  %v55_v20 = vmul.f32 %v399_v11, %v399_v11  ;;  %v428_v21 = vld [vmem:[%s539_s0 + $0x40] sm:$0xff]  ;;  %v44_v22 = vsel %vm27_vm0, %v412_v15, 0.0 }
   0x7   :  { %v53_v23 = vmul.f32 %v374_v4, %v374_v4  ;;  %v49_v24 = vadd.f32 %v48_v19, %v419_v18  ;;  %v54_v25 = vmul.f32 %v394_v10, %v394_v10  ;;  %v45_v26 = vadd.f32 %v44_v22, %v428_v21 }
   0x8   :  { %v68_v27 = vsel %vm27_vm0, %v55_v20, 0.0  ;;  %v52_v28 = vmul.f32 %v367_v2, %v367_v2  ;;  %v59_v29 = vmul.f32 %v384_v6, %v384_v6  ;;  %v57_v31 = vmul.f32 %v362_v1, %v362_v1 }
   0x9   :  { %42 = vadd.xlane.f32.xlu1 %v41_v16  ;;  %v64_v30 = vsel %vm27_vm0, %v53_v23, 0.0  ;;  %v69_v32 = vadd.f32 %v68_v27, %v54_v25  ;;  %v58_v33 = vmul.f32 %v379_v5, %v379_v5  ;;  %v56_v36 = vmul.f32 %v357_v0, %v357_v0 }
   0xa   :  { %34 = vadd.xlane.f32.xlu0 %v33_v17  ;;  %v65_v34 = vadd.f32 %v64_v30, %v52_v28  ;;  %v76_v35 = vsel %vm27_vm0, %v59_v29, 0.0  ;;  %v63_v37 = vmul.f32 %v407_v14, %v407_v14  ;;  %v72_v38 = vsel %vm27_vm0, %v57_v31, 0.0 }
   0xb   :  { %v61_v39 = vmul.f32 %v412_v15, %v412_v15  ;;  %v77_v40 = vadd.f32 %v76_v35, %v58_v33  ;;  %v62_v41 = vmul.f32 %v419_v18, %v419_v18  ;;  %v73_v42 = vadd.f32 %v72_v38, %v56_v36 }
   0xc   :  { %v84_v43 = vsel %vm27_vm0, %v63_v37, 0.0  ;;  %v60_v44 = vmul.f32 %v428_v21, %v428_v21  ;;  %v330_v48 = vmov 0  }
   0xd   :  { %50 = vadd.xlane.f32.xlu1 %v49_v24  ;;  %v80_v45 = vsel %vm27_vm0, %v61_v39, 0.0  ;;  %v85_v46 = vadd.f32 %v84_v43, %v62_v41  ;;  %294 = vset.pattern.permute.xlu0 %v330_v48  ;;  %v137_v39 = vld [vmem:[%s540_s1 + $0x8] sm:$0xff] }
   0xe   :  { %46 = vadd.xlane.f32.xlu0 %v45_v26  ;;  %v81_v47 = vadd.f32 %v80_v45, %v60_v44  ;;  %295 = vset.pattern.permute.xlu1 %v330_v48  ;;  %v139_v45 = vld [vmem:[%s540_s1 + $0x18] sm:$0xff] }
  0x11   :  { %70 = vadd.xlane.f32.xlu1 %v69_v32 }
  0x12   :  { %66 = vadd.xlane.f32.xlu0 %v65_v34 }
  0x15   :  { %78 = vadd.xlane.f32.xlu1 %v77_v40  ;;  %v136_v40 = vld [vmem:[%s540_s1] sm:$0xff] }
  0x16   :  { %74 = vadd.xlane.f32.xlu0 %v73_v42 }
  0x19   :  { %86 = vadd.xlane.f32.xlu1 %v85_v46  ;;  %v138_v46 = vld [vmem:[%s540_s1 + $0x10] sm:$0xff] }
  0x1a   :  { %82 = vadd.xlane.f32.xlu0 %v81_v47 }
  0x8e   :  { %v39_v49 = vpop.xlane.xlu1 %38 }
  0x8f   :  { %v31_v50 = vpop.xlane.xlu0 %30  ;;  %v468_v62 = vmul.f32 0.0051020407, %v39_v49 }
  0x90   :  { %v464_v56 = vmul.f32 0.0051020407, %v31_v50 }
  0x91   :  { %v114_v20 = vmul.f32 %v468_v62, %v468_v62 }
  0x92   :  { %v43_v51 = vpop.xlane.xlu1 %42  ;;  %v112_v63 = vmul.f32 %v464_v56, %v464_v56 }
  0x93   :  { %v35_v52 = vpop.xlane.xlu0 %34  ;;  %v103_v58 = vmul.f32 0.0051020407, %v43_v51  ;;  %v151_v51 = vld [vmem:[%s541_s2 + $0x18] sm:$0xff] }
  0x94   :  { %v462_v54 = vmul.f32 0.0051020407, %v35_v52  ;;  %v141_v52 = vld [vmem:[%s540_s1 + $0x28] sm:$0xff] }
  0x95   :  { %v115_v12 = vmul.f32 %v103_v58, %v103_v58 }
  0x96   :  { %v51_v53 = vpop.xlane.xlu1 %50  ;;  %v113_v59 = vmul.f32 %v462_v54, %v462_v54 }
  0x97   :  { %v47_v55 = vpop.xlane.xlu0 %46  ;;  %v105_v13 = vmul.f32 0.0051020407, %v51_v53 }
  0x98   :  { %v474_v22 = vmul.f32 0.0051020407, %v47_v55 }
  0x99   :  { %v117_v28 = vmul.f32 %v105_v13, %v105_v13 }
  0x9a   :  { %v71_v57 = vpop.xlane.xlu1 %70  ;;  %v116_v32 = vmul.f32 %v474_v22, %v474_v22 }
  0x9b   :  { %v107_v60 = vmul.f32 0.0051020407, %v71_v57  ;;  %v67_v61 = vpop.xlane.xlu0 %66 }
  0x9c   :  { %v106_v3 = vmul.f32 0.0051020407, %v67_v61 }
  0x9d   :  { %v119_v7 = vsub.f32 %v107_v60, %v113_v59  ;;  %v153_v60 = vld [vmem:[%s541_s2 + $0x28] sm:$0xff] }
  0x9e   :  { %v118_v8 = vsub.f32 %v106_v3, %v112_v63  ;;  %v79_v9 = vpop.xlane.xlu1 %78  ;;  %v140_v3 = vld [vmem:[%s540_s1 + $0x20] sm:$0xff] }
  0x9f   :  { %v125_v16 = vadd.f32 1e-05, %v119_v7  ;;  %v109_v17 = vmul.f32 0.0051020407, %v79_v9  ;;  %v75_v19 = vpop.xlane.xlu0 %74  ;;  %v148_v9 = vld [vmem:[%s541_s2] sm:$0xff] }
  0xa0   :  { %v124_v23 = vadd.f32 1e-05, %v118_v8  ;;  %v108_v24 = vmul.f32 0.0051020407, %v75_v19 }
  0xa1   :  { %296 = vrsqrt.f32 %v125_v16  ;;  %v121_v25 = vsub.f32 %v109_v17, %v115_v12 }
  0xa2   :  { %298 = vrsqrt.f32 %v124_v23  ;;  %v120_v26 = vsub.f32 %v108_v24, %v114_v20  ;;  %v87_v27 = vpop.xlane.xlu1 %86 }
  0xa3   :  { %v127_v29 = vadd.f32 1e-05, %v121_v25  ;;  %v111_v30 = vmul.f32 0.0051020407, %v87_v27  ;;  %v83_v31 = vpop.xlane.xlu0 %82 }
  0xa4   :  { %v126_v33 = vadd.f32 1e-05, %v120_v26  ;;  %v110_v34 = vmul.f32 0.0051020407, %v83_v31 }
  0xa5   :  { %300 = vrsqrt.f32 %v127_v29  ;;  %v123_v35 = vsub.f32 %v111_v30, %v117_v28 }
  0xa6   :  { %302 = vrsqrt.f32 %v126_v33  ;;  %v122_v36 = vsub.f32 %v110_v34, %v116_v32 }
  0xa7   :  { %v129_v37 = vadd.f32 1e-05, %v123_v35 }
  0xa8   :  { %v128_v38 = vadd.f32 1e-05, %v122_v36 }
  0xa9   :  { %304 = vrsqrt.f32 %v129_v37 }
  0xaa   :  { %306 = vrsqrt.f32 %v128_v38 }
  0xae   :  { %v297_v41 = vpop.eup %296 }
  0xaf   :  { %v299_v42 = vpop.eup %298  ;;  %v143_v43 = vmul.f32 %v297_v41, %v137_v39 }
  0xb0   :  { %v142_v44 = vmul.f32 %v299_v42, %v136_v40 }
  0xb1   :  { %173 = vperm.xlu1 %295, %v143_v43   ;;  %v155_v16 = vmul.f32 %v143_v43, %v462_v54  ;;  %v152_v54 = vld [vmem:[%s541_s2 + $0x20] sm:$0xff] }
  0xb2   :  { %v301_v47 = vpop.eup %300  ;;  %168 = vperm.xlu0 %294, %v142_v44  }
  0xb3   :  { %v303_v48 = vpop.eup %302  ;;  %v145_v49 = vmul.f32 %v301_v47, %v139_v45 }
  0xb4   :  { %v144_v50 = vmul.f32 %v303_v48, %v138_v46 }
  0xb5   :  { %v157_v53 = vmul.f32 %v145_v49, %v103_v58  ;;  %v154_v58 = vmul.f32 %v142_v44, %v464_v56  ;;  %v150_v56 = vld [vmem:[%s541_s2 + $0x10] sm:$0xff] }
  0xb6   :  { %v305_v55 = vpop.eup %304  ;;  %178 = vperm.xlu1 %295, %v144_v50   ;;  %v156_v19 = vmul.f32 %v144_v50, %v468_v62 }
  0xb7   :  { %v163_v57 = vsub.f32 %v151_v51, %v157_v53  ;;  %v147_v59 = vmul.f32 %v305_v55, %v141_v52  ;;  %v307_v61 = vpop.eup %306  ;;  %v160_v12 = vsub.f32 %v148_v9, %v154_v58 }
  0xb8   :  { %v146_v8 = vmul.f32 %v307_v61, %v140_v3  ;;  %v162_v20 = vsub.f32 %v150_v56, %v156_v19 }
  0xb9   :  { %225 = vperm.xlu0 %294, %v163_v57   ;;  %v159_v63 = vmul.f32 %v147_v59, %v105_v13  ;;  %v149_v13 = vld [vmem:[%s541_s2 + $0x8] sm:$0xff]  ;;  %s331_s2 = smov [#allocation2]  }
  0xba   :  { %183 = vperm.xlu1 %295, %v145_v49   ;;  %v161_v17 = vsub.f32 %v149_v13, %v155_v16  ;;  %v158_v23 = vmul.f32 %v146_v8, %v474_v22  ;;  %s279_s4 = sshll.u32 %s331_s2, 4  ;;  %s280_s4 = int_to_ptr.vmem [resolvable:$true] %s279_s4 }
  0xbb   :  { %v165_v7 = vsub.f32 %v153_v60, %v159_v63  ;;  %s308_s5 = scalar_lea.vmem %s280_s4, 1536  ;;  %p313_p1 = scmp.lt.s32.totalorder %s280_s4, %s280_s4 }
  0xbc   :  { %v164_v24 = vsub.f32 %v152_v54, %v158_v23  ;;  %p309_p0 = scmp.ne.s32.totalorder %s280_s4, %s308_s5  ;;  %p314_p2 = scmp.lt.s32.totalorder %s308_s5, %s308_s5 }
  0xbd   :  { %235 = vperm.xlu0 %294, %v165_v7  }
  0xbe   :  { %188 = vperm.xlu1 %295, %v146_v8   ;;  %p315_p3 = por %p314_p2, %p313_p1 }
  0xc0   :  { %p316_p4 = pnand %p315_p3, %p309_p0 }
  0xc2   :  { %193 = vperm.xlu1 %295, %v147_v59  }
  0xc6   :  { %210 = vperm.xlu1 %295, %v160_v12  }
  0xca   :  { %215 = vperm.xlu1 %295, %v161_v17  }
  0xce   :  { %220 = vperm.xlu1 %295, %v162_v20  }
  0xd2   :  { %230 = vperm.xlu1 %295, %v164_v24  }
 0x12c   :  { %v174_v25 = vpop.permute.xlu1 %173 }
 0x12d   :  { %v169_v27 = vpop.permute.xlu0 %168  ;;  %v198_v46 = vmul.f32 %v174_v25, %v394_v10  ;;  %v199_v47 = vmul.f32 %v174_v25, %v399_v11 }
 0x12e   :  { %v196_v39 = vmul.f32 %v169_v27, %v367_v2 }
 0x131   :  { %v179_v26 = vpop.permute.xlu1 %178 }
 0x132   :  { %v200_v49 = vmul.f32 %v179_v26, %v357_v0  ;;  %v201_v50 = vmul.f32 %v179_v26, %v362_v1 }
 0x134   :  { %v226_v30 = vpop.permute.xlu0 %225 }
 0x135   :  { %v184_v28 = vpop.permute.xlu1 %183 }
 0x136   :  { %v202_v62 = vmul.f32 %v184_v28, %v379_v5  ;;  %v203_v29 = vmul.f32 %v184_v28, %v384_v6  ;;  %v197_v5 = vmul.f32 %v169_v27, %v374_v4 }
 0x138   :  { %v244_v31 = vadd.f32 %v226_v30, %v202_v62  ;;  %v245_v32 = vadd.f32 %v226_v30, %v203_v29  ;;  %v236_v38 = vpop.permute.xlu0 %235 }
 0x139   :  { %v189_v33 = vpop.permute.xlu1 %188 }
 0x13a   :  { %v256_v22 = vmax.f32 %v244_v31, 0.0  ;;  %v257_v34 = vmax.f32 %v245_v32, 0.0  ;;  %v204_v55 = vmul.f32 %v189_v33, %v428_v21  ;;  %v205_v57 = vmul.f32 %v189_v33, %v412_v15 }
 0x13c   :  { %268 = vst [vmem:[#allocation2 + $0x30] sm:$0xff] %v256_v22  ;;  %269 = vst.msk [vmem:[#allocation2 + $0x38] sm:$0xff] %vm27_vm0, %v257_v34 }
 0x13d   :  { %v194_v35 = vpop.permute.xlu1 %193 }
 0x13e   :  { %v206_v36 = vmul.f32 %v194_v35, %v419_v18  ;;  %v207_v37 = vmul.f32 %v194_v35, %v407_v14 }
 0x140   :  { %v248_v6 = vadd.f32 %v236_v38, %v206_v36  ;;  %v249_v40 = vadd.f32 %v236_v38, %v207_v37 }
 0x141   :  { %v211_v41 = vpop.permute.xlu1 %210 }
 0x142   :  { %v260_v42 = vmax.f32 %v248_v6, 0.0  ;;  %v261_v43 = vmax.f32 %v249_v40, 0.0  ;;  %v238_v44 = vadd.f32 %v211_v41, %v196_v39  ;;  %v239_v45 = vadd.f32 %v211_v41, %v197_v5 }
 0x144   :  { %272 = vst [vmem:[#allocation2 + $0x50] sm:$0xff] %v260_v42  ;;  %273 = vst.msk [vmem:[#allocation2 + $0x58] sm:$0xff] %vm27_vm0, %v261_v43  ;;  %v250_v14 = vmax.f32 %v238_v44, 0.0  ;;  %v251_v18 = vmax.f32 %v239_v45, 0.0 }
 0x145   :  { %v216_v48 = vpop.permute.xlu1 %215 }
 0x146   :  { %262 = vst [vmem:[#allocation2] sm:$0xff] %v250_v14  ;;  %263 = vst.msk [vmem:[#allocation2 + $0x8] sm:$0xff] %vm27_vm0, %v251_v18  ;;  %v240_v2 = vadd.f32 %v216_v48, %v198_v46  ;;  %v241_v4 = vadd.f32 %v216_v48, %v199_v47 }
 0x148   :  { %v252_v51 = vmax.f32 %v240_v2, 0.0  ;;  %v253_v52 = vmax.f32 %v241_v4, 0.0 }
 0x149   :  { %v221_v10 = vpop.permute.xlu1 %220 }
 0x14a   :  { %264 = vst [vmem:[#allocation2 + $0x10] sm:$0xff] %v252_v51  ;;  %265 = vst.msk [vmem:[#allocation2 + $0x18] sm:$0xff] %vm27_vm0, %v253_v52  ;;  %v242_v11 = vadd.f32 %v221_v10, %v200_v49  ;;  %v243_v53 = vadd.f32 %v221_v10, %v201_v50 }
 0x14c   :  { %v254_v59 = vmax.f32 %v242_v11, 0.0  ;;  %v255_v60 = vmax.f32 %v243_v53, 0.0 }
 0x14d   :  { %v231_v61 = vpop.permute.xlu1 %230 }
 0x14e   :  { %266 = vst [vmem:[#allocation2 + $0x20] sm:$0xff] %v254_v59  ;;  %267 = vst.msk [vmem:[#allocation2 + $0x28] sm:$0xff] %vm27_vm0, %v255_v60  ;;  %v246_v0 = vadd.f32 %v231_v61, %v204_v55  ;;  %v247_v1 = vadd.f32 %v231_v61, %v205_v57 }
 0x150   :  { %v258_v63 = vmax.f32 %v246_v0, 0.0  ;;  %v259_v3 = vmax.f32 %v247_v1, 0.0 }
 0x152   :  { %270 = vst [vmem:[#allocation2 + $0x40] sm:$0xff] %v258_v63  ;;  %271 = vst.msk [vmem:[#allocation2 + $0x48] sm:$0xff] %vm27_vm0, %v259_v3 }
 0x153   :  { %319 = shalt.err (!%p316_p4)
}
 0x154   :  { %s332_s6 = smov 256   ;;  %s333_s7 = smov 16  }
 0x155   :  { %285 = dma.vmem_to_hbm [thread:$0]  %s280_s4, 1536, %s542_s3, [#allocation3], %s332_s6, %s332_s6, %s333_s7  }
 0x156   :  { %328 = dma.done.wait [#allocation3], 1536  }
 0x157   :  { %329 = vsyncadd [#allocation3], 4294965760 }
 0x158   :  { %289 = vsyncpa [#allocation3], 1 }

</bundles_post_ra>
